<compile_context>
chip_gen: v5e
topology: v5e:2x2
jax: 0.10.0
libtpu: 0.0.40
codegen_flags: <defaults>
</compile_context>

<pallas_src>
import jax
import jax.numpy as jnp
from jax.experimental import pallas as pl
from jax.experimental.pallas import tpu as pltpu


def _h_sigmoid_kernel(x_ref, o_ref):
    # Elementwise hot path: relu6(x + 3) / 6 == clamp(x+3, 0, 6) * (1/6).
    # Pure VPU work; the kernel is HBM-bandwidth bound, so keep this minimal.
    x = x_ref[...]
    y = jnp.minimum(jnp.maximum(x + 3.0, 0.0), 6.0) * (1.0 / 6.0)
    o_ref[...] = y.astype(o_ref.dtype)


# Lane-dense last dim (multiple of 128) and target row-tile.
# f32: (1024, 512) tile = 2 MiB -> in+out, double-buffered ~= 8 MiB resident,
# safely inside the scoped-VMEM defaults of v5e/v6e/v7x without extra flags.
_LANE = 512
_TARGET_TILE_ROWS = 1024


def _round_up(a, b):
    return ((a + b - 1) // b) * b


def h_sigmoid(x):
    """h_sigmoid forward. Accepts any shape; returns same shape/dtype."""
    orig_shape = x.shape
    orig_dtype = x.dtype
    total = x.size

    # Dtype-aware sublane multiple: 8 (4-byte), 16 (2-byte), 32 (1-byte).
    itemsize = jnp.dtype(orig_dtype).itemsize
    sublane = {4: 8, 2: 16, 1: 32}.get(itemsize, 8)

    # Repack everything into a (rows_padded, _LANE) lane-dense slab.
    rows = _round_up(total, _LANE) // _LANE
    tile_r = min(_TARGET_TILE_ROWS, _round_up(rows, sublane))
    tile_r = _round_up(tile_r, sublane)
    rows_padded = _round_up(rows, tile_r)
    padded_total = rows_padded * _LANE

    x_flat = x.reshape(-1)
    if padded_total != total:
        x_flat = jnp.pad(x_flat, (0, padded_total - total))
    x2 = x_flat.reshape(rows_padded, _LANE)

    grid = (rows_padded // tile_r,)

    out2 = pl.pallas_call(
        _h_sigmoid_kernel,
        out_shape=jax.ShapeDtypeStruct((rows_padded, _LANE), orig_dtype),
        grid_spec=pltpu.PrefetchScalarGridSpec(
            num_scalar_prefetch=0,
            grid=grid,
            in_specs=[pl.BlockSpec((tile_r, _LANE), lambda i: (i, 0))],
            out_specs=pl.BlockSpec((tile_r, _LANE), lambda i: (i, 0)),
        ),
        compiler_params=pltpu.CompilerParams(
            dimension_semantics=("parallel",),  # shards grid across TCs on v7x
        ),
    )(x2)

    out_flat = out2.reshape(-1)
    if padded_total != total:
        out_flat = out_flat[:total]
    return out_flat.reshape(orig_shape)


if __name__ == "__main__":
    key = jax.random.PRNGKey(0)
    x = jax.random.normal(key, (2, 4, 16, 16), dtype=jnp.float32) * 4.0

    out = h_sigmoid(x)
    out = jax.block_until_ready(out)

    # Reference check in plain JAX.
    ref = jnp.clip(x + 3.0, 0.0, 6.0) / 6.0
    assert out.shape == x.shape
    assert out.dtype == x.dtype
    assert jnp.allclose(out, ref, atol=1e-6), "mismatch vs reference"

    print("KERNEL_OK")
</pallas_src>

<mosaic_0001>
module attributes {stable_mosaic.version = 11 : i64} {
  func.func @_h_sigmoid_kernel(%arg0: i32, %arg1: memref<8x512xf32, #tpu.memory_space<vmem>>, %arg2: memref<8x512xf32, #tpu.memory_space<vmem>>) attributes {dimension_semantics = [#tpu.dimension_semantics<parallel>], iteration_bounds = array<i64: 1>, scalar_prefetch = 0 : i64, scratch_operands = 0 : i64, tpu.core_type = #tpu.core_type<tc>, window_params = [{transform_indices = @transform_0, window_bounds = array<i64: 8, 512>}, {transform_indices = @transform_1, window_bounds = array<i64: 8, 512>}]} {
    %c0 = arith.constant 0 : index
    %c0_0 = arith.constant 0 : index
    %0 = vector.load %arg1[%c0, %c0_0] : memref<8x512xf32, #tpu.memory_space<vmem>>, vector<8x512xf32>
    %cst = arith.constant 3.000000e+00 : f32
    %1 = vector.broadcast %cst : f32 to vector<8x512xf32>
    %2 = arith.addf %0, %1 : vector<8x512xf32>
    %cst_1 = arith.constant 0.000000e+00 : f32
    %3 = vector.broadcast %cst_1 : f32 to vector<8x512xf32>
    %4 = arith.maximumf %2, %3 : vector<8x512xf32>
    %cst_2 = arith.constant 6.000000e+00 : f32
    %5 = vector.broadcast %cst_2 : f32 to vector<8x512xf32>
    %6 = arith.minimumf %4, %5 : vector<8x512xf32>
    %cst_3 = arith.constant 0.166666672 : f32
    %7 = vector.broadcast %cst_3 : f32 to vector<8x512xf32>
    %8 = arith.mulf %6, %7 : vector<8x512xf32>
    %c0_4 = arith.constant 0 : index
    %c0_5 = arith.constant 0 : index
    %9 = vector.load %arg2[%c0_4, %c0_5] : memref<8x512xf32, #tpu.memory_space<vmem>>, vector<8x512xf32>
    tpu.vector_store %arg2[%c0_4, %c0_5], %8 {strides = array<i32>} : memref<8x512xf32, #tpu.memory_space<vmem>>, vector<8x512xf32>,
    return
  }
  func.func @transform_0(%arg0: i32) -> (i32, i32) {
    %c0_i32 = arith.constant 0 : i32
    %c0_i32_0 = arith.constant 0 : i32
    return %arg0, %c0_i32 : i32, i32
  }
  func.func @transform_1(%arg0: i32) -> (i32, i32) {
    %c0_i32 = arith.constant 0 : i32
    %c0_i32_0 = arith.constant 0 : i32
    return %arg0, %c0_i32 : i32, i32
  }
}

</mosaic_0001>

<bundles_post_ra>
// kernel: tpu_custom_call.1
= control target key start
LH: loop header
LB: loop body
LE: loop exit
PB: predicated region body
PF: predicated region fallthrough
CT: control target
= control target key end

     0   :  { %6 = vsyncpa [#allocation3], 0  ;;  %s136_s0 = inlined_call_operand.hbm [shape: f32[8,512], index: 0, kind: input, shape index: {}]   ;;  %s137_s1 = inlined_call_operand.hbm [shape: f32[8,512], index: 1, kind: output, shape index: {}]  }
   0x1   :  { %7 = vsyncpa [#allocation4], 0  ;;  %s13_s8 = sshll.u32 %s136_s0, 4  ;;  %s118_s9 = smov [#allocation2]   ;;  %s14_s8 = int_to_ptr.hbm [resolvable:$true] %s13_s8 }
   0x2   :  { %s15_s10 = sshll.u32 %s118_s9, 4  ;;  %s16_s10 = int_to_ptr.vmem [resolvable:$true] %s15_s10 }
   0x3   :  { %18 = dma.hbm_to_vmem [thread:$0]  %s14_s8, 512, %s16_s10, [#allocation3]  }
   0x4   :  { %114 = dma.done.wait [#allocation3], 512  }
   0x5   :  { %115 = vsyncadd [#allocation3], 4294966784  ;;  %v23_v0 = vld [vmem:[#allocation2] sm:$0xff]  ;;  %v24_v1 = vld [vmem:[#allocation2 + $0x8] sm:$0xff]  ;;  %s119_s0 = smov [#allocation5]   ;;  %s54_s14 = sshll.u32 %s137_s1, 4  ;;  %s55_s14 = int_to_ptr.hbm [resolvable:$true] %s54_s14 }
   0x6   :  { %v25_v2 = vld [vmem:[#allocation2 + $0x10] sm:$0xff]  ;;  %v27_v3 = vadd.f32 3.0, %v23_v0  ;;  %v28_v4 = vadd.f32 3.0, %v24_v1  ;;  %v26_v6 = vld [vmem:[#allocation2 + $0x18] sm:$0xff]  ;;  %s52_s11 = sshll.u32 %s119_s0, 4  ;;  %s53_s11 = int_to_ptr.vmem [resolvable:$true] %s52_s11 }
   0x7   :  { %v29_v5 = vadd.f32 3.0, %v25_v2  ;;  %v30_v7 = vadd.f32 3.0, %v26_v6 }
   0x8   :  { %v31_v8 = vmax.f32 %v27_v3, 0.0  ;;  %v32_v9 = vmax.f32 %v28_v4, 0.0 }
   0x9   :  { %v33_v10 = vmax.f32 %v29_v5, 0.0  ;;  %v34_v11 = vmax.f32 %v30_v7, 0.0 }
   0xa   :  { %v35_v12 = vmin.f32 %v31_v8, 6.0  ;;  %v36_v13 = vmin.f32 %v32_v9, 6.0 }
   0xb   :  { %v37_v14 = vmin.f32 %v33_v10, 6.0  ;;  %v38_v15 = vmin.f32 %v34_v11, 6.0 }
   0xc   :  { %v39_v16 = vmul.f32 0.16666667, %v35_v12  ;;  %v40_v17 = vmul.f32 0.16666667, %v36_v13 }
   0xd   :  { %v41_v18 = vmul.f32 0.16666667, %v37_v14  ;;  %v42_v19 = vmul.f32 0.16666667, %v38_v15 }
   0xe   :  { %43 = vst [vmem:[#allocation5] sm:$0xff] %v39_v16 }
   0xf   :  { %44 = vst [vmem:[#allocation5 + $0x8] sm:$0xff] %v40_v17 }
  0x10   :  { %45 = vst [vmem:[#allocation5 + $0x10] sm:$0xff] %v41_v18 }
  0x11   :  { %46 = vst [vmem:[#allocation5 + $0x18] sm:$0xff] %v42_v19 }
  0x12   :  { %57 = dma.vmem_to_hbm [thread:$0]  %s53_s11, 512, %s55_s14, [#allocation4]  }
  0x13   :  { %116 = dma.done.wait [#allocation4], 512  }
  0x14   :  { %117 = vsyncadd [#allocation4], 4294966784 }
  0x15   :  { %62 = vsyncpa [#allocation3], 1 }
  0x16   :  { %63 = vsyncpa [#allocation4], 1 }

</bundles_post_ra>
